<compile_context>
chip_gen: v5e
topology: v5e:2x2
jax: 0.10.0
libtpu: 0.0.40
codegen_flags: <defaults>
</compile_context>

<pallas_src>
import functools

import jax
import jax.numpy as jnp
from jax.experimental import pallas as pl
from jax.experimental.pallas import tpu as pltpu

# Large negative (finite) bias used to mask padded vocab columns out of the
# softmax without risking inf-inf NaNs anywhere in the online LSE.
_NEG_BIG = -1e30


# ----------------------------------------------------------------------------
# MLM kernel: log_softmax(x @ W + b), vocab axis tiled, online LSE, in-place
# fixup of the resident output block (single [tile_r, V] buffer).
# ----------------------------------------------------------------------------
def _mlm_kernel(x_ref, w_ref, b_ref, o_ref, m_ref, l_ref, *, n_v):
    """One (row-tile, vocab-tile) grid step.

    x_ref : (tile_r, H)      bf16 row tile (resident across the vocab axis)
    w_ref : (H, tile_v)      bf16 weight tile (streamed per vocab step)
    b_ref : (1, tile_v)      f32 bias tile (streamed)
    o_ref : (tile_r, V_pad)  output block, resident across the vocab axis;
                             holds raw bf16 logits until the last vocab step,
                             then fixed up in place to log-probs.
    m_ref : (tile_r, 1)      running max (f32)
    l_ref : (tile_r, 1)      running rescaled sum-exp (f32)
    """
    j = pl.program_id(1)
    tile_v = w_ref.shape[1]

    @pl.when(j == 0)
    def _init():
        m_ref[...] = jnp.full_like(m_ref, -jnp.inf)
        l_ref[...] = jnp.zeros_like(l_ref)

    # bf16 operands on the MXU, f32 accumulation; bias add in f32.
    s = jnp.dot(x_ref[...], w_ref[...],
                preferred_element_type=jnp.float32) + b_ref[...]

    # Stash this vocab tile's raw logits directly into the resident output
    # block (lane-aligned dynamic offset, lane-dense store) -- the only
    # [tile_r, V] buffer in the kernel.
    start = pl.multiple_of(j * tile_v, 128)
    o_ref[:, pl.ds(start, tile_v)] = s.astype(o_ref.dtype)

    # Online log-sum-exp update in f32 (exp -> EUP slot, max/sum -> XLU).
    m_old = m_ref[...]
    m_new = jnp.maximum(m_old, jnp.max(s, axis=-1, keepdims=True))
    l_ref[...] = l_ref[...] * jnp.exp(m_old - m_new) + jnp.sum(
        jnp.exp(s - m_new), axis=-1, keepdims=True)
    m_ref[...] = m_new

    @pl.when(j == n_v - 1)
    def _finalize():
        lse = m_ref[...] + jnp.log(l_ref[...])          # f32 (tile_r, 1)
        # In-place fixup: read back each resident logits tile, subtract lse in
        # f32, rewrite as bf16.  Static offsets -> unmasked lane-dense stores.
        # (Per review this epilogue is expected to hide under the next row
        # tile's W DMA/matmul; convert to a fori_loop only if measured exposed.)
        for t in range(n_v):
            sl = slice(t * tile_v, (t + 1) * tile_v)
            o_ref[:, sl] = (o_ref[:, sl].astype(jnp.float32)
                            - lse).astype(o_ref.dtype)


# ----------------------------------------------------------------------------
# Tiling / VMEM planning helpers (generation-aware)
# ----------------------------------------------------------------------------
def _round_up(n, m):
    return ((n + m - 1) // m) * m


def _vmem_capacity_bytes():
    """Physical VMEM of the current TPU generation (fallback: 64 MiB = v7x)."""
    try:
        return int(pltpu.get_tpu_info().vmem_capacity_bytes)
    except Exception:
        return 64 * 1024 * 1024


def _vmem_bytes(tile_r, tile_v, H, V_pad, out_bytes):
    """Per-row-tile VMEM footprint of the kernel's buffers."""
    return (2 * tile_r * H * 2            # x row tile (bf16), double-buffered
            + 2 * H * tile_v * 2          # W tile (bf16), double-buffered
            + 2 * 8 * tile_v * 4          # bias tile (f32, 8-sublane pad), dbuf
            + 2 * tile_r * V_pad * out_bytes  # resident output block, dbuf
            + 2 * tile_r * 128 * 4)       # m / l scratch (f32, lane-padded)


def _pick_row_tile(R, fits):
    """Largest MXU-aligned row tile that fits the VMEM budget.

    Prefers an exact divisor of R (no padding); otherwise the largest fitting
    tile not larger than R rounded to a sublane multiple.
    """
    cands = (512, 256, 128, 64, 32, 16, 8)
    fitting = [t for t in cands if fits(t)]
    if not fitting:
        return 8
    for t in fitting:
        if t <= R and R % t == 0:
            return t
    cap = _round_up(max(R, 8), 8)
    for t in fitting:
        if t <= cap:
            return t
    return fitting[-1]


# ----------------------------------------------------------------------------
# MLM head wrapper
# ----------------------------------------------------------------------------
def masked_language_model(x, w_mlm, b_mlm, *, tile_r=None, tile_v=None,
                          out_dtype=jnp.bfloat16):
    """x: [B, S, H] -> log-probs [B, S, V] (out_dtype, default bf16)."""
    B, S, H = x.shape
    Hw, V = w_mlm.shape
    assert Hw == H
    R = B * S
    out_bytes = jnp.dtype(out_dtype).itemsize

    # ---- vocab tiling / padding -------------------------------------------
    if tile_v is None:
        tile_v = 512 if V >= 512 else _round_up(V, 128)
    assert tile_v % 128 == 0
    V_pad = _round_up(V, tile_v)

    # ---- row tiling, generation-aware VMEM budget --------------------------
    vmem_cap = _vmem_capacity_bytes()
    budget = int(vmem_cap * 0.85)            # leave room for compiler scratch
    if tile_r is None:
        tile_r = _pick_row_tile(
            R, lambda t: _vmem_bytes(t, tile_v, H, V_pad, out_bytes) <= budget)
    assert tile_r % 8 == 0
    R_pad = _round_up(R, tile_r)
    n_r, n_v = R_pad // tile_r, V_pad // tile_v
    # TODO(synk): on v7x (2 TensorCores) an even n_r balances the "parallel"
    # row axis perfectly; for large n_r an odd count costs only ~1/n_r, so we
    # don't shrink tile_r (and lose W reuse) to force it.

    # ---- operand prep: bf16 streams, pad ragged shapes ----------------------
    x2d = x.reshape(R, H)
    if R_pad != R:
        x2d = jnp.pad(x2d, ((0, R_pad - R), (0, 0)))
    x2d = x2d.astype(jnp.bfloat16)

    # Avoid re-casting the big weight every call: pass bf16 weights through.
    w = w_mlm if w_mlm.dtype == jnp.bfloat16 else w_mlm.astype(jnp.bfloat16)
    b = b_mlm.astype(jnp.float32)
    if V_pad != V:
        w = jnp.pad(w, ((0, 0), (0, V_pad - V)))
        # Padded vocab columns get a huge negative bias so they contribute
        # exactly zero to the softmax normalizer.
        b = jnp.pad(b, ((0, V_pad - V),), constant_values=_NEG_BIG)
    b2d = b.reshape(1, V_pad)

    est = _vmem_bytes(tile_r, tile_v, H, V_pad, out_bytes)
    vmem_limit = int(min(vmem_cap, max(est + (4 << 20), 32 << 20)))

    kernel = functools.partial(_mlm_kernel, n_v=n_v)

    out = pl.pallas_call(
        kernel,
        out_shape=jax.ShapeDtypeStruct((R_pad, V_pad), out_dtype),
        grid_spec=pltpu.PrefetchScalarGridSpec(
            num_scalar_prefetch=0,
            grid=(n_r, n_v),                       # reduction (vocab) axis last
            in_specs=[
                pl.BlockSpec((tile_r, H), lambda i, j: (i, 0)),   # resident over j
                pl.BlockSpec((H, tile_v), lambda i, j: (0, j)),   # streamed
                pl.BlockSpec((1, tile_v), lambda i, j: (0, j)),   # streamed
            ],
            # Resident output block (single [tile_r, V_pad] buffer; raw logits
            # then in-place log-prob fixup).  Default double-buffering kept so
            # row-tile i writeback overlaps row-tile i+1 compute; the budget
            # above accounts for both buffers.
            out_specs=pl.BlockSpec((tile_r, V_pad), lambda i, j: (i, 0)),
            scratch_shapes=[
                pltpu.VMEM((tile_r, 1), jnp.float32),   # running max
                pltpu.VMEM((tile_r, 1), jnp.float32),   # running sum-exp
            ],
        ),
        compiler_params=pltpu.CompilerParams(
            dimension_semantics=("parallel", "arbitrary"),
            vmem_limit_bytes=vmem_limit,
        ),
    )(x2d, w, b2d)

    out = out[:R, :V]
    return out.reshape(B, S, V)


# ----------------------------------------------------------------------------
# NSP head: intentionally plain JAX (lane dim = 2 -> no useful Pallas kernel)
# ----------------------------------------------------------------------------
def next_sentence_prediction(x, w_nsp, b_nsp):
    """x: [B, S, H] -> log-probs [B, 2] from the CLS token x[:, 0]."""
    logits = x[:, 0, :].astype(jnp.float32) @ w_nsp + b_nsp
    return jax.nn.log_softmax(logits, axis=-1)


def bertlm_forward(x, params, *, tile_r=None, tile_v=None):
    """Mirrors BERTLM.forward on the encoder output x:
    returns (next_sentence_logprobs, mask_lm_logprobs)."""
    nsp = next_sentence_prediction(x, params["w_nsp"], params["b_nsp"])
    mlm = masked_language_model(x, params["w_mlm"], params["b_mlm"],
                                tile_r=tile_r, tile_v=tile_v)
    return nsp, mlm


# ----------------------------------------------------------------------------
# Deterministic parameter init (torch.nn.Linear style uniform +/- 1/sqrt(fan_in))
# The MLM weight is stored in bf16 so the wrapper never re-casts it per call.
# ----------------------------------------------------------------------------
def init_params(key, hidden, vocab_size):
    k1, k2, k3, k4 = jax.random.split(key, 4)
    lim = 1.0 / jnp.sqrt(hidden)
    # stored as (H, out) so the kernel does x @ W directly
    w_mlm = jax.random.uniform(k1, (hidden, vocab_size), jnp.float32,
                               -lim, lim).astype(jnp.bfloat16)
    b_mlm = jax.random.uniform(k2, (vocab_size,), jnp.float32, -lim, lim)
    w_nsp = jax.random.uniform(k3, (hidden, 2), jnp.float32, -lim, lim)
    b_nsp = jax.random.uniform(k4, (2,), jnp.float32, -lim, lim)
    return {"w_mlm": w_mlm, "b_mlm": b_mlm, "w_nsp": w_nsp, "b_nsp": b_nsp}


# ----------------------------------------------------------------------------
# Main
# ----------------------------------------------------------------------------
if __name__ == "__main__":
    B, S, H, V = 2, 8, 32, 512

    key = jax.random.PRNGKey(0)
    k_x, k_p = jax.random.split(key)

    # x stands in for the BERT encoder output (backbone definition not given).
    x = jax.random.normal(k_x, (B, S, H), dtype=jnp.float32)
    params = init_params(k_p, H, V)

    # tile_v=128 -> 4 vocab steps, exercising the online log-softmax path.
    nsp, mlm = bertlm_forward(x, params, tile_v=128)
    nsp = jax.block_until_ready(nsp)
    mlm = jax.block_until_ready(mlm)

    # Pure-JAX reference (same bf16 operand / f32 accumulation recipe).
    x_bf = x.astype(jnp.bfloat16)
    ref_logits = jnp.dot(x_bf, params["w_mlm"],
                         preferred_element_type=jnp.float32) + params["b_mlm"]
    ref_mlm = jax.nn.log_softmax(ref_logits, axis=-1)
    ref_nsp = jax.nn.log_softmax(
        x[:, 0] @ params["w_nsp"] + params["b_nsp"], axis=-1)

    assert nsp.shape == (B, 2) and mlm.shape == (B, S, V)
    assert mlm.dtype == jnp.bfloat16
    assert jnp.allclose(nsp, ref_nsp, atol=1e-5)
    # bf16 logits + bf16 output: allow ~one bf16 ulp at |logprob| ~ 16.
    assert jnp.allclose(mlm.astype(jnp.float32), ref_mlm, atol=1e-1)

    # Ragged-shape path: R and V not multiples of the tiles -> exercises row
    # zero-padding and vocab padding with masked (-1e30) bias columns.
    B2, S2, V2 = 2, 7, 200
    k_x2, k_p2 = jax.random.split(jax.random.PRNGKey(1))
    x2 = jax.random.normal(k_x2, (B2, S2, H), dtype=jnp.float32)
    p2 = init_params(k_p2, H, V2)
    mlm2 = masked_language_model(x2, p2["w_mlm"], p2["b_mlm"], tile_v=128)
    mlm2 = jax.block_until_ready(mlm2)
    ref2 = jax.nn.log_softmax(
        jnp.dot(x2.astype(jnp.bfloat16), p2["w_mlm"],
                preferred_element_type=jnp.float32) + p2["b_mlm"], axis=-1)
    assert mlm2.shape == (B2, S2, V2)
    assert jnp.allclose(mlm2.astype(jnp.float32), ref2, atol=1e-1)

    print("KERNEL_OK")
</pallas_src>

<mosaic_0001>
module attributes {stable_mosaic.version = 11 : i64} {
  func.func @_mlm_kernel(%arg0: i32, %arg1: i32, %arg2: memref<16x32xbf16, #tpu.memory_space<vmem>>, %arg3: memref<32x128xbf16, #tpu.memory_space<vmem>>, %arg4: memref<1x128xf32, #tpu.memory_space<vmem>>, %arg5: memref<16x512xbf16, #tpu.memory_space<vmem>>, %arg6: memref<16x1xf32, #tpu.memory_space<vmem>>, %arg7: memref<16x1xf32, #tpu.memory_space<vmem>>) attributes {dimension_semantics = [#tpu.dimension_semantics<parallel>, #tpu.dimension_semantics<arbitrary>], iteration_bounds = array<i64: 1, 4>, scalar_prefetch = 0 : i64, scratch_operands = 2 : i64, tpu.core_type = #tpu.core_type<tc>, window_params = [{transform_indices = @transform_0, window_bounds = array<i64: 16, 32>}, {transform_indices = @transform_1, window_bounds = array<i64: 32, 128>}, {transform_indices = @transform_2, window_bounds = array<i64: 1, 128>}, {transform_indices = @transform_3, window_bounds = array<i64: 16, 512>}]} {
    %c0_i32 = arith.constant 0 : i32
    %0 = arith.cmpi eq, %arg1, %c0_i32 : i32
    %1 = arith.extui %0 : i1 to i32
    %c0_i32_0 = arith.constant 0 : i32
    %2 = arith.cmpi ne, %1, %c0_i32_0 : i32
    scf.if %2 {
      %cst_18 = arith.constant 0xFF800000 : f32
      %33 = vector.broadcast %cst_18 : f32 to vector<16x1xf32>
      %c0_19 = arith.constant 0 : index
      %c0_20 = arith.constant 0 : index
      %34 = vector.load %arg6[%c0_19, %c0_20] : memref<16x1xf32, #tpu.memory_space<vmem>>, vector<16x1xf32>
      tpu.vector_store %arg6[%c0_19, %c0_20], %33 {strides = array<i32>} : memref<16x1xf32, #tpu.memory_space<vmem>>, vector<16x1xf32>,
      %cst_21 = arith.constant 0.000000e+00 : f32
      %35 = vector.broadcast %cst_21 : f32 to vector<16x1xf32>
      %c0_22 = arith.constant 0 : index
      %c0_23 = arith.constant 0 : index
      %36 = vector.load %arg7[%c0_22, %c0_23] : memref<16x1xf32, #tpu.memory_space<vmem>>, vector<16x1xf32>
      tpu.vector_store %arg7[%c0_22, %c0_23], %35 {strides = array<i32>} : memref<16x1xf32, #tpu.memory_space<vmem>>, vector<16x1xf32>,
    } else {
    }
    %c0 = arith.constant 0 : index
    %c0_1 = arith.constant 0 : index
    %3 = vector.load %arg2[%c0, %c0_1] : memref<16x32xbf16, #tpu.memory_space<vmem>>, vector<16x32xbf16>
    %c0_2 = arith.constant 0 : index
    %c0_3 = arith.constant 0 : index
    %4 = vector.load %arg3[%c0_2, %c0_3] : memref<32x128xbf16, #tpu.memory_space<vmem>>, vector<32x128xbf16>
    %cst = arith.constant dense<0.000000e+00> : vector<16x128xf32>
    %5 = tpu.matmul %3, %4, %cst {dimension_numbers = #tpu.dot_dimension_numbers<[1], [0], [0], [1], [0, 0, 1, 1], [], []>} : vector<16x32xbf16>, vector<32x128xbf16>, vector<16x128xf32> -> vector<16x128xf32>
    %c0_4 = arith.constant 0 : index
    %c0_5 = arith.constant 0 : index
    %6 = vector.load %arg4[%c0_4, %c0_5] : memref<1x128xf32, #tpu.memory_space<vmem>>, vector<1x128xf32>
    %7 = vector.broadcast %6 : vector<1x128xf32> to vector<16x128xf32>
    %8 = arith.addf %5, %7 : vector<16x128xf32>
    %c128_i32 = arith.constant 128 : i32
    %9 = arith.muli %arg1, %c128_i32 : i32
    %10 = tpu.assume_multiple %9, 128 : i32
    %11 = arith.truncf %8 : vector<16x128xf32> to vector<16x128xbf16>
    %c0_6 = arith.constant 0 : index
    %12 = arith.index_cast %10 : i32 to index
    %13 = vector.load %arg5[%c0_6, %12] : memref<16x512xbf16, #tpu.memory_space<vmem>>, vector<16x128xbf16>
    tpu.vector_store %arg5[%c0_6, %12], %11 {strides = array<i32>} : memref<16x512xbf16, #tpu.memory_space<vmem>>, vector<16x128xbf16>,
    %c0_7 = arith.constant 0 : index
    %c0_8 = arith.constant 0 : index
    %14 = vector.load %arg6[%c0_7, %c0_8] : memref<16x1xf32, #tpu.memory_space<vmem>>, vector<16x1xf32>
    %cst_9 = arith.constant dense<0xFF800000> : vector<16xf32>
    %15 = vector.multi_reduction <maximumf>, %8, %cst_9 [1] : vector<16x128xf32> to vector<16xf32>
    %16 = vector.shape_cast %15 : vector<16xf32> to vector<16x1xf32>
    %17 = arith.maximumf %14, %16 : vector<16x1xf32>
    %c0_10 = arith.constant 0 : index
    %c0_11 = arith.constant 0 : index
    %18 = vector.load %arg7[%c0_10, %c0_11] : memref<16x1xf32, #tpu.memory_space<vmem>>, vector<16x1xf32>
    %19 = arith.subf %14, %17 : vector<16x1xf32>
    %20 = math.exp %19 : vector<16x1xf32>
    %21 = arith.mulf %18, %20 : vector<16x1xf32>
    %22 = vector.broadcast %17 : vector<16x1xf32> to vector<16x128xf32>
    %23 = arith.subf %8, %22 : vector<16x128xf32>
    %24 = math.exp %23 : vector<16x128xf32>
    %cst_12 = arith.constant dense<0.000000e+00> : vector<16xf32>
    %25 = vector.multi_reduction <add>, %24, %cst_12 [1] : vector<16x128xf32> to vector<16xf32>
    %26 = vector.shape_cast %25 : vector<16xf32> to vector<16x1xf32>
    %27 = arith.addf %21, %26 : vector<16x1xf32>
    %c0_13 = arith.constant 0 : index
    %c0_14 = arith.constant 0 : index
    %28 = vector.load %arg7[%c0_13, %c0_14] : memref<16x1xf32, #tpu.memory_space<vmem>>, vector<16x1xf32>
    tpu.vector_store %arg7[%c0_13, %c0_14], %27 {strides = array<i32>} : memref<16x1xf32, #tpu.memory_space<vmem>>, vector<16x1xf32>,
    %c0_15 = arith.constant 0 : index
    %c0_16 = arith.constant 0 : index
    %29 = vector.load %arg6[%c0_15, %c0_16] : memref<16x1xf32, #tpu.memory_space<vmem>>, vector<16x1xf32>
    tpu.vector_store %arg6[%c0_15, %c0_16], %17 {strides = array<i32>} : memref<16x1xf32, #tpu.memory_space<vmem>>, vector<16x1xf32>,
    %c3_i32 = arith.constant 3 : i32
    %30 = arith.cmpi eq, %arg1, %c3_i32 : i32
    %31 = arith.extui %30 : i1 to i32
    %c0_i32_17 = arith.constant 0 : i32
    %32 = arith.cmpi ne, %31, %c0_i32_17 : i32
    scf.if %32 {
      %c0_18 = arith.constant 0 : index
      %c0_19 = arith.constant 0 : index
      %33 = vector.load %arg6[%c0_18, %c0_19] : memref<16x1xf32, #tpu.memory_space<vmem>>, vector<16x1xf32>
      %c0_20 = arith.constant 0 : index
      %c0_21 = arith.constant 0 : index
      %34 = vector.load %arg7[%c0_20, %c0_21] : memref<16x1xf32, #tpu.memory_space<vmem>>, vector<16x1xf32>
      %35 = math.log %34 : vector<16x1xf32>
      %36 = arith.addf %33, %35 : vector<16x1xf32>
      %c0_22 = arith.constant 0 : index
      %c0_23 = arith.constant 0 : index
      %37 = vector.load %arg5[%c0_22, %c0_23] : memref<16x512xbf16, #tpu.memory_space<vmem>>, vector<16x128xbf16>
      %38 = arith.extf %37 : vector<16x128xbf16> to vector<16x128xf32>
      %39 = vector.broadcast %36 : vector<16x1xf32> to vector<16x128xf32>
      %40 = arith.subf %38, %39 : vector<16x128xf32>
      %41 = arith.truncf %40 : vector<16x128xf32> to vector<16x128xbf16>
      %c0_24 = arith.constant 0 : index
      %c0_25 = arith.constant 0 : index
      %42 = vector.load %arg5[%c0_24, %c0_25] : memref<16x512xbf16, #tpu.memory_space<vmem>>, vector<16x128xbf16>
      tpu.vector_store %arg5[%c0_24, %c0_25], %41 {strides = array<i32>} : memref<16x512xbf16, #tpu.memory_space<vmem>>, vector<16x128xbf16>,
      %c0_26 = arith.constant 0 : index
      %c128 = arith.constant 128 : index
      %43 = vector.load %arg5[%c0_26, %c128] : memref<16x512xbf16, #tpu.memory_space<vmem>>, vector<16x128xbf16>
      %44 = arith.extf %43 : vector<16x128xbf16> to vector<16x128xf32>
      %45 = vector.broadcast %36 : vector<16x1xf32> to vector<16x128xf32>
      %46 = arith.subf %44, %45 : vector<16x128xf32>
      %47 = arith.truncf %46 : vector<16x128xf32> to vector<16x128xbf16>
      %c0_27 = arith.constant 0 : index
      %c128_28 = arith.constant 128 : index
      %48 = vector.load %arg5[%c0_27, %c128_28] : memref<16x512xbf16, #tpu.memory_space<vmem>>, vector<16x128xbf16>
      tpu.vector_store %arg5[%c0_27, %c128_28], %47 {strides = array<i32>} : memref<16x512xbf16, #tpu.memory_space<vmem>>, vector<16x128xbf16>,
      %c0_29 = arith.constant 0 : index
      %c256 = arith.constant 256 : index
      %49 = vector.load %arg5[%c0_29, %c256] : memref<16x512xbf16, #tpu.memory_space<vmem>>, vector<16x128xbf16>
      %50 = arith.extf %49 : vector<16x128xbf16> to vector<16x128xf32>
      %51 = vector.broadcast %36 : vector<16x1xf32> to vector<16x128xf32>
      %52 = arith.subf %50, %51 : vector<16x128xf32>
      %53 = arith.truncf %52 : vector<16x128xf32> to vector<16x128xbf16>
      %c0_30 = arith.constant 0 : index
      %c256_31 = arith.constant 256 : index
      %54 = vector.load %arg5[%c0_30, %c256_31] : memref<16x512xbf16, #tpu.memory_space<vmem>>, vector<16x128xbf16>
      tpu.vector_store %arg5[%c0_30, %c256_31], %53 {strides = array<i32>} : memref<16x512xbf16, #tpu.memory_space<vmem>>, vector<16x128xbf16>,
      %c0_32 = arith.constant 0 : index
      %c384 = arith.constant 384 : index
      %55 = vector.load %arg5[%c0_32, %c384] : memref<16x512xbf16, #tpu.memory_space<vmem>>, vector<16x128xbf16>
      %56 = arith.extf %55 : vector<16x128xbf16> to vector<16x128xf32>
      %57 = vector.broadcast %36 : vector<16x1xf32> to vector<16x128xf32>
      %58 = arith.subf %56, %57 : vector<16x128xf32>
      %59 = arith.truncf %58 : vector<16x128xf32> to vector<16x128xbf16>
      %c0_33 = arith.constant 0 : index
      %c384_34 = arith.constant 384 : index
      %60 = vector.load %arg5[%c0_33, %c384_34] : memref<16x512xbf16, #tpu.memory_space<vmem>>, vector<16x128xbf16>
      tpu.vector_store %arg5[%c0_33, %c384_34], %59 {strides = array<i32>} : memref<16x512xbf16, #tpu.memory_space<vmem>>, vector<16x128xbf16>,
    } else {
    }
    return
  }
  func.func @transform_0(%arg0: i32, %arg1: i32) -> (i32, i32) {
    %c0_i32 = arith.constant 0 : i32
    %c0_i32_0 = arith.constant 0 : i32
    return %arg0, %c0_i32 : i32, i32
  }
  func.func @transform_1(%arg0: i32, %arg1: i32) -> (i32, i32) {
    %c0_i32 = arith.constant 0 : i32
    %c0_i32_0 = arith.constant 0 : i32
    return %c0_i32, %arg1 : i32, i32
  }
  func.func @transform_2(%arg0: i32, %arg1: i32) -> (i32, i32) {
    %c0_i32 = arith.constant 0 : i32
    %c0_i32_0 = arith.constant 0 : i32
    return %c0_i32, %arg1 : i32, i32
  }
  func.func @transform_3(%arg0: i32, %arg1: i32) -> (i32, i32) {
    %c0_i32 = arith.constant 0 : i32
    %c0_i32_0 = arith.constant 0 : i32
    return %arg0, %c0_i32 : i32, i32
  }
}

</mosaic_0001>

<bundles_post_ra>
// kernel: tpu_custom_call.1
= control target key start
LH: loop header
LB: loop body
LE: loop exit
PB: predicated region body
PF: predicated region fallthrough
CT: control target
= control target key end

     0   :  { %8 = vsyncpa [#allocation5], 0  ;;  %s1021_s0 = inlined_call_operand.hbm [shape: bf16[16,32], index: 0, kind: input, shape index: {}]   ;;  %s1022_s1 = inlined_call_operand.hbm [shape: bf16[32,512], index: 1, kind: input, shape index: {}]   ;;  %s1023_s2 = inlined_call_operand.hbm [shape: f32[1,512], index: 2, kind: input, shape index: {}]   ;;  %s1024_s3 = inlined_call_operand.hbm [shape: bf16[16,512], index: 3, kind: output, shape index: {}]  }
   0x1   :  { %9 = vsyncpa [#allocation8], 0 }
   0x2   :  { %11 = vsyncpa [#allocation8 + $0x1], 0 }
   0x3   :  { %12 = vsyncpa [#allocation6], 0  ;;  %s880_s12 = smov 0   ;;  %s882_s13 = smov 0  }
   0x4   :  { %s884_s14 = smov 0   ;;  %s886_s15 = smov 0  }
   0x5   :  { %s888_s16 = smov 0   ;;  %s890_s17 = smov 0  }
   0x6 LB: > { %s27_s18 = sadd.s32 1, %s843_s16  ;;  %s63_s19 = sadd.s32 1, %s835_s14  ;;  %s847_s17 = sphi %s890_s17, %s18_s17   ;;  %s843_s16 = sphi %s888_s16, %s1033_s16   ;;  %s839_s15 = sphi %s886_s15, %s1032_s15   ;;  %s835_s14 = sphi %s884_s14, %s1031_s14   ;;  %s831_s13 = sphi %s882_s13, %s1030_s13   ;;  %s827_s12 = sphi %s880_s12, %s1029_s12  }
   0x7   : > { %p28_p0 = scmp.ge.s32.totalorder %s27_s18, 4  ;;  %p70_p1 = scmp.ne.s32.totalorder %s835_s14, %s831_s13 }
   0x8   : > { %p71_p2 = scmp.eq.s32.totalorder %s847_s17, 0  ;;  %p592_p5 = scmp.lt.s32.totalorder %s847_s17, 4 }
   0x9   : > { %s1035_s18 = smov (%p28_p0, %s27_s18), 0  ;;  %s169_s22 = sand.u32 1, %s847_s17  }
   0xa   : > { %p917_p3 = por %p71_p2, %p70_p1  ;;  %s60_s21 = ssub.s32 %s843_s16, %s1035_s18 }
   0xb   : > { %p61_p4 = scmp.eq.s32.totalorder %s60_s21, 0  ;;  %s171_s23 = sand.u32 1, %s835_s14  }
   0xc   : > { %s539_s25 = sshll.u32 %s171_s23, 4  ;;  %s540_s26 = sshll.u32 %s843_s16, 2 }
   0xd   : > { %s927_s24 = scalar_select %p61_p4, %s835_s14, %s63_s19  }
   0xe   : > { %s177_s29 = scalar_lea.hbm %s1022_s1, %s540_s26  ;;  %s173_s30 = scalar_lea.vmem [#allocation7], %s539_s25 }
   0xf   : > { %s180_s4 = sshll.u32 %s173_s30, 4  ;;  %s178_s5 = sshll.u32 %s177_s29, 4  ;;  %s181_s4 = int_to_ptr.vmem [resolvable:$true] %s180_s4  ;;  %s179_s5 = int_to_ptr.hbm [resolvable:$true] %s178_s5 }
  0x10   : > { %p937_p6 = pnand %p592_p5, %p917_p3  ;;  %s941_s7 = scalar_lea.sflag [#allocation8], %s169_s22 }
  0x11   : > { %s849_s8 = smov 256   ;;  %s850_s9 = smov 64  }
  0x12   : > { %s851_s10 = smov 4   ;;  %s947_s11 = sadd.s32 4294967295, %s847_s17  }
  0x13   : > { %587 = dma.hbm_to_vmem [thread:$0]  (!%p937_p6), %s179_s5, 256, %s181_s4, %s941_s7, %s849_s8, %s850_s9, %s851_s10  }
  0x14   : > { %p76_p7 = scmp.ne.s32.totalorder %s831_s13, %s827_s12  ;;  %p77_p8 = scmp.eq.s32.totalorder %s947_s11, 0 }
  0x15   : > { %p536_p9 = scmp.ge.s32.totalorder %s847_s17, 1  ;;  %p139_p10 = scmp.lt.s32.totalorder %s847_s17, 5 }
  0x16   : > { %p956_p11 = por %p77_p8, %p76_p7  ;;  %s153_s22 = sshll.u32 %s1021_s0, 4  ;;  %s154_s22 = int_to_ptr.hbm [resolvable:$true] %s153_s22 }
  0x17   : > { %p963_p12 = pnand %p536_p9, %p139_p10  ;;  %s852_s12 = smov [#allocation4]  }
  0x18   : > { %s155_s26 = sshll.u32 %s852_s12, 4  ;;  %s196_s29 = scalar_lea.hbm %s1023_s2, %s843_s16  ;;  %s156_s26 = int_to_ptr.vmem [resolvable:$true] %s155_s26 }
  0x19   : > { %p580_p13 = pneg %p963_p12  ;;  %s198_s30 = sshll.u32 %s196_s29, 4  ;;  %s199_s30 = int_to_ptr.hbm [resolvable:$true] %s198_s30 }
  0x1a   : > { %s193_s4 = scalar_lea.vmem [#allocation9], %s171_s23  ;;  %209 = sbr.rel (%p963_p12) target bundleno = 704 (0x2c0), region = 32 }
  0x1b   : > { %p581_p0 = pnand %p580_p13, %p77_p8  ;;  %s200_s5 = sshll.u32 %s193_s4, 4  ;;  %s201_s5 = int_to_ptr.vmem [resolvable:$true] %s200_s5 }
  0x1c   : > { %590 = dma.hbm_to_vmem [thread:$0]  (!%p937_p6), %s199_s30, 16, %s201_s5, %s941_s7  }
  0x1d   : > { %583 = dma.hbm_to_vmem [thread:$0]  (!%p581_p0), %s154_s22, 128, %s156_s26, [#allocation5], %s850_s9, %s850_s9, %s851_s10  }
  0x1f   : > { %814 = dma.done.wait (%p77_p8), [#allocation5], 128  }
  0x20   : > { %816 = vsyncadd (%p77_p8), [#allocation5], 4294967168  ;;  %s216_s8 = sand.u32 1, %s947_s11   ;;  %s218_s20 = sand.u32 1, %s831_s13  }
  0x21   : > { %s543_s23 = sshll.u32 %s218_s20, 4  ;;  %s217_s21 = scalar_lea.sflag [#allocation8], %s216_s8 }
  0x22   : > { %s220_s12 = scalar_lea.vmem [#allocation7], %s543_s23 }
  0x23   : > { %818 = dma.done.wait (%p956_p11), %s217_s21, 272  }
  0x24   : > { %820 = vsyncadd (%p956_p11), %s217_s21, 4294967024  ;;  %s229_s6 = scalar_lea.vmem [#allocation9], %s218_s20  ;;  %p544_p1 = scmp.ne.s32.totalorder %s839_s15, 0 }
  0x26   : > { %258 = sbr.rel (%p544_p1) target bundleno = 48 (0x30), region = 48 }
  0x2b   : > { %vm259_vm0 = vcmask 7168   ;;  %v853_v0 = vmov -inf   ;;  %v854_v1 = vmov 0.0  }
  0x2c   : > { %260 = vst.msk [vmem:[#allocation2] sm:$0xff] %vm259_vm0, %v853_v0 }
  0x2d   : > { %261 = vst.msk [vmem:[#allocation2 + $0x8] sm:$0xff] %vm259_vm0, %v853_v0 }
  0x2e   : > { %262 = vst.msk [vmem:[#allocation3] sm:$0xff] %vm259_vm0, %v854_v1 }
  0x2f   : > { %263 = vst.msk [vmem:[#allocation3 + $0x8] sm:$0xff] %vm259_vm0, %v854_v1 }
  0x30 PF: > { %v567_v2 = vld [vmem:[%s220_s12 + $0x8] sm:$0xff]  ;;  %v566_v3 = vld [vmem:[%s220_s12] sm:$0xff]  ;;  %vm291_vm1 = vcmask 261120   ;;  %s558_s7 = sshll.u32 %s839_s15, 7  ;;  %v855_v12 = vmov 0   ;;  %vm358_vm2 = vcmask 7168  }
  0x31   : > { %301 = vmatpush.bf16.msra.mxu0 %v567_v2  ;;  %v565_v4 = vld [vmem:[#allocation4] sm:$0xff]  ;;  %s312_s9 = sshra.s32 %s558_s7, 7  ;;  %655 = vset.pattern.permute.xlu1 %v855_v12  ;;  %p560_p2 = scmp.ne.s32.totalorder %s839_s15, 3 }
  0x32   : > { %v657_v5 = vld [vmem:[%s229_s6] ss:$0 sm:$0xff]  ;;  %s559_s10 = sshll.u32 %s312_s9, 2  ;;  %656 = vset.pattern.permute.xlu0 %v855_v12 }
  0x33   : > { %s315_s19 = scalar_lea.vmem [#allocation10], %s559_s10  ;;  %v318_v13 = vld [vmem:[#allocation2] sm:$0xff] }
  0x34   : > { %v319_v17 = vld [vmem:[#allocation2 + $0x8] sm:$0xff] }
  0x35   : > { %302 = vmatpush.bf16.msra.mxu0 %v566_v3  ;;  %v326_v32 = vld [vmem:[#allocation3] sm:$0xff] }
  0x36   : > { %v327_v37 = vld [vmem:[#allocation3 + $0x8] sm:$0xff] }
  0x38   : > { %557 = vmatmul.msk.bf16.vlgmr.msra.gmra.mxu0 %vm291_vm1, %v565_v4 }
  0xb5   : > { %v304_v6 = vpop.f32.mrf.mxu0 }
  0xb6   : > { %v305_v7 = vadd.f32 %v657_v5, %v304_v6 }
  0xb8   : > { %v310_v8 = vpack.c.bf16 %v305_v7, %v305_v7  ;;  %320 = vmax.xlane.f32.xlu0 %v305_v7 }
  0xba   : > { %316 = vst [vmem:[%s315_s19] sm:$0xf] %v310_v8 }
  0xbd   : > { %v306_v9 = vpop.f32.mrf.mxu0 }
  0xbe   : > { %v307_v10 = vadd.f32 %v657_v5, %v306_v9 }
  0xc0   : > { %v311_v11 = vpack.c.bf16 %v307_v10, %v307_v10  ;;  %322 = vmax.xlane.f32.xlu0 %v307_v10 }
  0xc2   : > { %317 = vst [vmem:[%s315_s19 + $0x10] sm:$0xf] %v311_v11 }
 0x12b   : > { %v321_v14 = vpop.xlane.xlu0 %320 }
 0x12c   : > { %v324_v15 = vmax.f32 %v318_v13, %v321_v14 }
 0x12e   : > { %v328_v16 = vsub.f32 %v318_v13, %v324_v15  ;;  %361 = vst.msk [vmem:[#allocation2] sm:$0xff] %vm358_vm2, %v324_v15  ;;  %338 = vperm.xlu1 %655, %v324_v15  }
 0x130   : > { %v330_v29 = vmul.f32 1.442695, %v328_v16 }
 0x133   : > { %v323_v18 = vpop.xlane.xlu0 %322 }
 0x134   : > { %v325_v19 = vmax.f32 %v319_v17, %v323_v18 }
 0x136   : > { %v329_v20 = vsub.f32 %v319_v17, %v325_v19  ;;  %362 = vst.msk [vmem:[#allocation2 + $0x8] sm:$0xff] %vm358_vm2, %v325_v19  ;;  %343 = vperm.xlu1 %655, %v325_v19  }
 0x138   : > { %v332_v30 = vmul.f32 1.442695, %v329_v20 }
 0x1a0   : > { %v339_v21 = vpop.permute.xlu1 %338 }
 0x1a1   : > { %v346_v22 = vsub.f32 %v305_v7, %v339_v21 }
 0x1a3   : > { %v348_v23 = vmul.f32 1.442695, %v346_v22 }
 0x1a5   : > { %658 = vpow2.f32 %v348_v23 }
 0x1a8   : > { %v344_v24 = vpop.permute.xlu1 %343 }
 0x1a9   : > { %v347_v25 = vsub.f32 %v307_v10, %v344_v24 }
 0x1ab   : > { %v659_v26 = vpop.eup %658  ;;  %v350_v27 = vmul.f32 1.442695, %v347_v25 }
 0x1ac   : > { %352 = vadd.xlane.f32.xlu2 %v659_v26 }
 0x1ad   : > { %660 = vpow2.f32 %v350_v27 }
 0x1ae   : > { %662 = vpow2.f32 %v330_v29 }
 0x1af   : > { %664 = vpow2.f32 %v332_v30 }
 0x1b3   : > { %v661_v28 = vpop.eup %660 }
 0x1b4   : > { %354 = vadd.xlane.f32.xlu2 %v661_v28  ;;  %v663_v31 = vpop.eup %662 }
 0x1b5   : > { %v334_v33 = vmul.f32 %v663_v31, %v326_v32  ;;  %v665_v36 = vpop.eup %664 }
 0x1b6   : > { %v335_v38 = vmul.f32 %v665_v36, %v327_v37 }
 0x21f   : > { %v353_v34 = vpop.xlane.xlu2 %352 }
 0x220   : > { %v356_v35 = vadd.f32 %v353_v34, %v334_v33 }
 0x222   : > { %359 = vst.msk [vmem:[#allocation3] sm:$0xff] %vm358_vm2, %v356_v35 }
 0x226   : > { %366 = sbr.rel (%p560_p2) target bundleno = 698 (0x2ba), region = 52 }
 0x227   : > { %v355_v39 = vpop.xlane.xlu2 %354 }
 0x228   : > { %v357_v40 = vadd.f32 %v355_v39, %v335_v38 }
 0x22a   : > { %360 = vst.msk [vmem:[#allocation3 + $0x8] sm:$0xff] %vm358_vm2, %v357_v40 }
 0x22b   : > { %v369_v41 = vld [vmem:[#allocation3] sm:$0xff]  ;;  %v856_v42 = vmov 0   ;;  %v367_v45 = vld [vmem:[#allocation2] sm:$0xff]  ;;  %v368_v50 = vld [vmem:[#allocation2 + $0x8] sm:$0xff] }
 0x22c   : > { %666 = vset.pattern.permute.xlu0 %v856_v42  ;;  %667 = vlog2.f32 %v369_v41  ;;  %v377_v52 = vld [vmem:[#allocation10] sm:$0xff]   ;;  %v407_v53 = vld [vmem:[#allocation10 + $0x8] sm:$0xff]   ;;  %v378_v63 = vld [vmem:[#allocation10 + $0x10] sm:$0xff]  }
 0x22d   : > { %v379_v54 = vunpack.c.l.bf16 %v377_v52  ;;  %v399_v55 = vunpack.c.h.bf16 %v377_v52  ;;  %v409_v56 = vunpack.c.l.bf16 %v407_v53  ;;  %v419_v57 = vunpack.c.h.bf16 %v407_v53  ;;  %v408_v0 = vld [vmem:[#allocation10 + $0x18] sm:$0xff]  }
 0x22e   : > { %v380_v5 = vunpack.c.l.bf16 %v378_v63  ;;  %v400_v6 = vunpack.c.h.bf16 %v378_v63  ;;  %v410_v7 = vunpack.c.l.bf16 %v408_v0  ;;  %v420_v8 = vunpack.c.h.bf16 %v408_v0 }
 0x231   : > { %v370_v43 = vld [vmem:[#allocation3 + $0x8] sm:$0xff] }
 0x232   : > { %669 = vlog2.f32 %v370_v43  ;;  %v668_v44 = vpop.eup %667 }
 0x233   : > { %v372_v46 = vmul.f32 0.6931472, %v668_v44 }
 0x235   : > { %v375_v48 = vadd.f32 %v372_v46, %v367_v45 }
 0x237   : > { %383 = vperm.xlu0 %666, %v375_v48  }
 0x238   : > { %v670_v47 = vpop.eup %669 }
 0x239   : > { %v374_v49 = vmul.f32 0.6931472, %v670_v47 }
 0x23b   : > { %v376_v51 = vadd.f32 %v374_v49, %v368_v50 }
 0x23f   : > { %388 = vperm.xlu0 %666, %v376_v51  }
 0x2a9   : > { %v384_v58 = vpop.permute.xlu0 %383 }
 0x2aa   : > { %v391_v59 = vsub.f32 %v379_v54, %v384_v58  ;;  %v401_v60 = vsub.f32 %v399_v55, %v384_v58  ;;  %v411_v61 = vsub.f32 %v409_v56, %v384_v58  ;;  %v421_v62 = vsub.f32 %v419_v57, %v384_v58 }
 0x2ac   : > { %v393_v1 = vpack.c.bf16 %v391_v59, %v391_v59  ;;  %v403_v2 = vpack.c.bf16 %v401_v60, %v401_v60  ;;  %v413_v3 = vpack.c.bf16 %v411_v61, %v411_v61  ;;  %v423_v4 = vpack.c.bf16 %v421_v62, %v421_v62 }
 0x2ae   : > { %395 = vst [vmem:[#allocation10] sm:$0xf] %v393_v1 }
 0x2af   : > { %405 = vst [vmem:[#allocation10 + $0x4] sm:$0xf] %v403_v2 }
 0x2b0   : > { %415 = vst [vmem:[#allocation10 + $0x8] sm:$0xf] %v413_v3 }
 0x2b1   : > { %425 = vst [vmem:[#allocation10 + $0xc] sm:$0xf] %v423_v4  ;;  %v389_v9 = vpop.permute.xlu0 %388 }
 0x2b2   : > { %v392_v10 = vsub.f32 %v380_v5, %v389_v9  ;;  %v402_v11 = vsub.f32 %v400_v6, %v389_v9  ;;  %v412_v12 = vsub.f32 %v410_v7, %v389_v9  ;;  %v422_v13 = vsub.f32 %v420_v8, %v389_v9 }
 0x2b4   : > { %v394_v14 = vpack.c.bf16 %v392_v10, %v392_v10  ;;  %v404_v15 = vpack.c.bf16 %v402_v11, %v402_v11  ;;  %v414_v16 = vpack.c.bf16 %v412_v12, %v412_v12  ;;  %v424_v17 = vpack.c.bf16 %v422_v13, %v422_v13 }
 0x2b6   : > { %396 = vst [vmem:[#allocation10 + $0x10] sm:$0xf] %v394_v14 }
 0x2b7   : > { %406 = vst [vmem:[#allocation10 + $0x14] sm:$0xf] %v404_v15 }
 0x2b8   : > { %416 = vst [vmem:[#allocation10 + $0x18] sm:$0xf] %v414_v16 }
 0x2b9   : > { %426 = vst [vmem:[#allocation10 + $0x1c] sm:$0xf] %v424_v17 }
 0x2ba PF: > { %p594_p3 = scmp.eq.s32.totalorder %s947_s11, 3  ;;  %s438_s25 = sshll.u32 %s1024_s3, 4  ;;  %s439_s25 = int_to_ptr.hbm [resolvable:$true] %s438_s25 }
 0x2bb   : > { %s857_s26 = smov [#allocation10]   ;;  %s858_s28 = smov 256  }
 0x2bc   : > { %s436_s27 = sshll.u32 %s857_s26, 4  ;;  %s859_s29 = smov 16   ;;  %s437_s27 = int_to_ptr.vmem [resolvable:$true] %s436_s27 }
 0x2bd   : > { %577 = dma.vmem_to_hbm [thread:$0]  (%p594_p3), %s437_s27, 512, %s439_s25, [#allocation6], %s858_s28, %s858_s28, %s859_s29  }
 0x2be   : > { %822 = dma.done.wait (%p594_p3), [#allocation6], 512  }
 0x2bf   : > { %824 = vsyncadd (%p594_p3), [#allocation6], 4294966784 }
 0x2c0 PF: > { %s18_s17 = sadd.s32 1, %s847_s17   ;;  %s1029_s12 = smov %s831_s13 }
 0x2c1   : > { %p15_p4 = scmp.ge.s32.totalorder %s18_s17, 6   ;;  %s1030_s13 = smov %s835_s14 }
 0x2c2   : > { %s1031_s14 = smov %s927_s24  ;;  %s1032_s15 = smov %s843_s16 }
 0x2c3   : > { %s1033_s16 = smov %s1035_s18  ;;  %17 = sbr.rel (!%p15_p4) target bundleno = 6 (0x6), region = 96 }
 0x2c8   :  { %455 = vsyncpa [#allocation5], 1 }
 0x2c9   :  { %457 = vsyncpa [#allocation5 + $0x1], 1 }
 0x2ca   :  { %458 = vsyncpa [#allocation8], 1 }
 0x2cb   :  { %460 = vsyncpa [#allocation8 + $0x1], 1 }
 0x2cc   :  { %461 = vsyncpa [#allocation6], 1 }
 0x2cd   :  { %463 = vsyncpa [#allocation6 + $0x1], 1 }

</bundles_post_ra>
